<compile_context>
chip_gen: v5e
topology: v5e:2x2
jax: 0.10.0
libtpu: 0.0.40
codegen_flags: <defaults>
</compile_context>

<pallas_src>
import functools

import jax
import jax.numpy as jnp
from jax.experimental import pallas as pl
from jax.experimental.pallas import tpu as pltpu


# Budget for the double-buffered input + output blocks of a single grid step.
_BLOCK_VMEM_BUDGET = 24 * 1024 * 1024
# Scoped VMEM we ask the compiler for (leaves headroom on v7x's 64 MiB/TC).
_VMEM_LIMIT_BYTES = 40 * 1024 * 1024


# ---------------------------------------------------------------------------
# Path A: fully fused kernel (whole (b_tile, C, S) slab resident in VMEM).
# ---------------------------------------------------------------------------
def _se_fused_kernel(x_ref, w1t_ref, w2_ref, o_ref):
    # x_ref block: (bt, C, S); w1t_ref: (C, Hid) == W1.T; w2_ref: (C, Hid) == W2
    x = x_ref[...].astype(jnp.float32)                  # (bt, C, S)
    w1t = w1t_ref[...].astype(jnp.float32)              # (C, Hid)
    w2 = w2_ref[...].astype(jnp.float32)                # (C, Hid)

    # Squeeze: global average pool over the spatial (lane) axis.
    pooled = jnp.mean(x, axis=2, keepdims=True)         # (bt, C, 1)

    # Excitation: relu(pooled @ W1.T) then sigmoid(hidden @ W2.T), done as
    # broadcast-multiply + reduce (tiny FCs -> VPU/XLU only, f32 accuracy).
    hidden = jnp.sum(pooled * w1t[None, :, :], axis=1, keepdims=True)  # (bt,1,H)
    hidden = jnp.maximum(hidden, 0.0)
    gate = jnp.sum(w2[None, :, :] * hidden, axis=2, keepdims=True)     # (bt,C,1)
    gate = jax.nn.sigmoid(gate)

    # Scale: per-channel gate broadcast over all spatial positions.
    o_ref[...] = (x * gate).astype(o_ref.dtype)


# ---------------------------------------------------------------------------
# Path B kernel 1: accumulate pooled sum over spatial tiles, emit gate (B,C,1).
# ---------------------------------------------------------------------------
def _pool_gate_kernel(x_ref, w1t_ref, w2_ref, gate_ref, acc_ref, *,
                      s_total, s_tile):
    si = pl.program_id(1)

    @pl.when(si == 0)
    def _init():
        acc_ref[...] = jnp.zeros_like(acc_ref)

    x = x_ref[...].astype(jnp.float32)                  # (1, C, s_tile)
    if s_total % s_tile != 0:
        # Mask out-of-bounds lanes of the ragged last spatial tile.
        lane = jax.lax.broadcasted_iota(jnp.int32, x.shape, 2)
        valid = (si * s_tile + lane) < s_total
        x = jnp.where(valid, x, 0.0)
    acc_ref[...] += jnp.sum(x, axis=2, keepdims=True)   # (1, C, 1)

    @pl.when(si == pl.num_programs(1) - 1)
    def _finalize():
        pooled = acc_ref[...] * (1.0 / float(s_total))            # (1, C, 1)
        w1t = w1t_ref[...].astype(jnp.float32)                    # (C, Hid)
        w2 = w2_ref[...].astype(jnp.float32)                      # (C, Hid)
        hidden = jnp.sum(pooled * w1t[None, :, :], axis=1, keepdims=True)
        hidden = jnp.maximum(hidden, 0.0)
        gate = jnp.sum(w2[None, :, :] * hidden, axis=2, keepdims=True)
        gate_ref[...] = jax.nn.sigmoid(gate)                      # (1, C, 1)


# ---------------------------------------------------------------------------
# Path B kernel 2: stream x and apply the per-channel gate.
# ---------------------------------------------------------------------------
def _scale_kernel(x_ref, gate_ref, o_ref):
    x = x_ref[...].astype(jnp.float32)                  # (1, C, s_tile)
    o_ref[...] = (x * gate_ref[...]).astype(o_ref.dtype)


def _pick_b_tile(b, per_batch_bytes, budget_bytes):
    """Largest batch tile (divisor of b) fitting the VMEM block budget.

    Keeps >= 2 grid steps when possible so megacore (2 TCs) can shard the
    "parallel" batch axis.
    """
    cap = max(1, budget_bytes // per_batch_bytes)
    if b >= 2:
        cap = min(cap, max(1, b // 2))
    best = 1
    for t in range(1, min(b, cap) + 1):
        if b % t == 0:
            best = t
    return best


def se_layer(x, w1, w2, *, max_block_bytes=_BLOCK_VMEM_BUDGET,
             vmem_limit_bytes=_VMEM_LIMIT_BYTES):
    """JAX/Pallas equivalent of SELayer.forward.

    x:  (B, C, D, H, W)    feature maps (NCDHW, like PyTorch)
    w1: (C // r, C)        first Linear weight (PyTorch layout: out x in)
    w2: (C, C // r)        second Linear weight
    """
    b, c, d, h, w = x.shape
    s = d * h * w
    hid = w1.shape[0]
    assert w1.shape == (hid, c), (w1.shape, (hid, c))
    assert w2.shape == (c, hid), (w2.shape, (c, hid))

    x3 = x.reshape(b, c, s)        # contiguous reshape: spatial -> lane axis
    w1t = w1.T                     # (C, Hid); tiny one-time transpose outside

    itemsize = jnp.dtype(x.dtype).itemsize
    # Double-buffered input + output blocks per batch element.
    per_batch_bytes = 4 * c * s * itemsize

    if per_batch_bytes <= max_block_bytes:
        # ---- Path A: fully fused, grid over batch tiles only. -------------
        b_tile = _pick_b_tile(b, per_batch_bytes, max_block_bytes)
        out3 = pl.pallas_call(
            _se_fused_kernel,
            out_shape=jax.ShapeDtypeStruct((b, c, s), x.dtype),
            grid=(b // b_tile,),
            in_specs=[
                pl.BlockSpec((b_tile, c, s), lambda i: (i, 0, 0)),
                pl.BlockSpec((c, hid), lambda i: (0, 0)),
                pl.BlockSpec((c, hid), lambda i: (0, 0)),
            ],
            out_specs=pl.BlockSpec((b_tile, c, s), lambda i: (i, 0, 0)),
            compiler_params=pltpu.CompilerParams(
                dimension_semantics=("parallel",),
                vmem_limit_bytes=vmem_limit_bytes),
        )(x3, w1t, w2)
    else:
        # ---- Path B: spatially tiled two-pass (pool+gate, then scale). ----
        s_tile = (max_block_bytes // (4 * c * itemsize)) // 128 * 128
        s_tile = max(s_tile, 128)
        if s_tile >= s:
            s_tile = s             # single full-width spatial tile
        n_s = pl.cdiv(s, s_tile)

        gate = pl.pallas_call(
            functools.partial(_pool_gate_kernel, s_total=s, s_tile=s_tile),
            out_shape=jax.ShapeDtypeStruct((b, c, 1), jnp.float32),
            grid=(b, n_s),
            in_specs=[
                pl.BlockSpec((1, c, s_tile), lambda i, j: (i, 0, j)),
                pl.BlockSpec((c, hid), lambda i, j: (0, 0)),
                pl.BlockSpec((c, hid), lambda i, j: (0, 0)),
            ],
            out_specs=pl.BlockSpec((1, c, 1), lambda i, j: (i, 0, 0)),
            scratch_shapes=[pltpu.VMEM((1, c, 1), jnp.float32)],
            compiler_params=pltpu.CompilerParams(
                dimension_semantics=("parallel", "arbitrary"),
                vmem_limit_bytes=vmem_limit_bytes),
        )(x3, w1t, w2)

        out3 = pl.pallas_call(
            _scale_kernel,
            out_shape=jax.ShapeDtypeStruct((b, c, s), x.dtype),
            grid=(b, n_s),
            in_specs=[
                pl.BlockSpec((1, c, s_tile), lambda i, j: (i, 0, j)),
                pl.BlockSpec((1, c, 1), lambda i, j: (i, 0, 0)),
            ],
            out_specs=pl.BlockSpec((1, c, s_tile), lambda i, j: (i, 0, j)),
            compiler_params=pltpu.CompilerParams(
                dimension_semantics=("parallel", "parallel"),
                vmem_limit_bytes=vmem_limit_bytes),
        )(x3, gate)

    return out3.reshape(b, c, d, h, w)


def _reference_se_layer(x, w1, w2):
    """Pure-JAX reference matching the PyTorch module."""
    y = jnp.mean(x.astype(jnp.float32), axis=(2, 3, 4))            # (B, C)
    y = jnp.maximum(y @ w1.T.astype(jnp.float32), 0.0)             # (B, Hid)
    y = jax.nn.sigmoid(y @ w2.T.astype(jnp.float32))               # (B, C)
    return (x.astype(jnp.float32) * y[:, :, None, None, None]).astype(x.dtype)


if __name__ == "__main__":
    key = jax.random.PRNGKey(0)

    def _check(batch, channel, reduction, depth, height, width, **kwargs):
        hidden = max(1, channel // reduction)
        k = jax.random.fold_in(key, batch * 1000 + channel + depth)
        kx, k1, k2 = jax.random.split(k, 3)
        x = jax.random.normal(kx, (batch, channel, depth, height, width),
                              dtype=jnp.float32)
        w1 = jax.random.normal(k1, (hidden, channel),
                               dtype=jnp.float32) / jnp.sqrt(channel)
        w2 = jax.random.normal(k2, (channel, hidden),
                               dtype=jnp.float32) / jnp.sqrt(hidden)
        out = jax.block_until_ready(se_layer(x, w1, w2, **kwargs))
        ref = _reference_se_layer(x, w1, w2)
        assert out.shape == ref.shape, (out.shape, ref.shape)
        assert jnp.allclose(out, ref, atol=1e-5, rtol=1e-5), "mismatch vs ref"

    # Path A: fully fused single-pass kernel (S = 256).
    _check(2, 32, 16, 4, 8, 8)
    # Path B: spatially tiled two-pass path, forced via a tiny block budget;
    # S = 240 -> tiles of 128 with a ragged (masked) last tile.
    _check(2, 32, 16, 4, 6, 10, max_block_bytes=64 * 1024)

    print("KERNEL_OK")
</pallas_src>

<mosaic_0001>
module attributes {stable_mosaic.version = 11 : i64} {
  func.func @_se_fused_kernel(%arg0: i32, %arg1: memref<1x32x256xf32, #tpu.memory_space<vmem>>, %arg2: memref<32x2xf32, #tpu.memory_space<vmem>>, %arg3: memref<32x2xf32, #tpu.memory_space<vmem>>, %arg4: memref<1x32x256xf32, #tpu.memory_space<vmem>>) attributes {dimension_semantics = [#tpu.dimension_semantics<parallel>], iteration_bounds = array<i64: 2>, scalar_prefetch = 0 : i64, scratch_operands = 0 : i64, tpu.core_type = #tpu.core_type<tc>, window_params = [{transform_indices = @transform_0, window_bounds = array<i64: 1, 32, 256>}, {pipeline_mode = #tpu.pipeline_mode<synchronous>, transform_indices = @transform_1, window_bounds = array<i64: 32, 2>}, {pipeline_mode = #tpu.pipeline_mode<synchronous>, transform_indices = @transform_2, window_bounds = array<i64: 32, 2>}, {transform_indices = @transform_3, window_bounds = array<i64: 1, 32, 256>}]} {
    %c0 = arith.constant 0 : index
    %c0_0 = arith.constant 0 : index
    %c0_1 = arith.constant 0 : index
    %0 = vector.load %arg1[%c0, %c0_0, %c0_1] : memref<1x32x256xf32, #tpu.memory_space<vmem>>, vector<1x32x256xf32>
    %c0_2 = arith.constant 0 : index
    %c0_3 = arith.constant 0 : index
    %1 = vector.load %arg2[%c0_2, %c0_3] : memref<32x2xf32, #tpu.memory_space<vmem>>, vector<32x2xf32>
    %c0_4 = arith.constant 0 : index
    %c0_5 = arith.constant 0 : index
    %2 = vector.load %arg3[%c0_4, %c0_5] : memref<32x2xf32, #tpu.memory_space<vmem>>, vector<32x2xf32>
    %cst = arith.constant dense<0.000000e+00> : vector<1x32xf32>
    %3 = vector.multi_reduction <add>, %0, %cst [2] : vector<1x32x256xf32> to vector<1x32xf32>
    %4 = vector.shape_cast %3 : vector<1x32xf32> to vector<1x32x1xf32>
    %cst_6 = arith.constant 2.560000e+02 : f32
    %5 = vector.broadcast %cst_6 : f32 to vector<1x32x1xf32>
    %6 = arith.divf %4, %5 : vector<1x32x1xf32>
    %7 = vector.shape_cast %1 : vector<32x2xf32> to vector<1x32x2xf32>
    %8 = vector.broadcast %6 : vector<1x32x1xf32> to vector<1x32x2xf32>
    %9 = arith.mulf %8, %7 : vector<1x32x2xf32>
    %cst_7 = arith.constant dense<0.000000e+00> : vector<1x2xf32>
    %10 = vector.multi_reduction <add>, %9, %cst_7 [1] : vector<1x32x2xf32> to vector<1x2xf32>
    %11 = vector.shape_cast %10 : vector<1x2xf32> to vector<1x1x2xf32>
    %cst_8 = arith.constant 0.000000e+00 : f32
    %12 = vector.broadcast %cst_8 : f32 to vector<1x1x2xf32>
    %13 = arith.maximumf %11, %12 : vector<1x1x2xf32>
    %14 = vector.shape_cast %2 : vector<32x2xf32> to vector<1x32x2xf32>
    %15 = vector.broadcast %13 : vector<1x1x2xf32> to vector<1x32x2xf32>
    %16 = arith.mulf %14, %15 : vector<1x32x2xf32>
    %cst_9 = arith.constant dense<0.000000e+00> : vector<1x32xf32>
    %17 = vector.multi_reduction <add>, %16, %cst_9 [2] : vector<1x32x2xf32> to vector<1x32xf32>
    %18 = vector.shape_cast %17 : vector<1x32xf32> to vector<1x32x1xf32>
    %19 = arith.negf %18 : vector<1x32x1xf32>
    %20 = math.exp %19 : vector<1x32x1xf32>
    %cst_10 = arith.constant 1.000000e+00 : f32
    %21 = vector.broadcast %cst_10 : f32 to vector<1x32x1xf32>
    %22 = arith.addf %21, %20 : vector<1x32x1xf32>
    %23 = arith.divf %21, %22 : vector<1x32x1xf32>
    %24 = vector.broadcast %23 : vector<1x32x1xf32> to vector<1x32x256xf32>
    %25 = arith.mulf %0, %24 : vector<1x32x256xf32>
    %c0_11 = arith.constant 0 : index
    %c0_12 = arith.constant 0 : index
    %c0_13 = arith.constant 0 : index
    %26 = vector.load %arg4[%c0_11, %c0_12, %c0_13] : memref<1x32x256xf32, #tpu.memory_space<vmem>>, vector<1x32x256xf32>
    tpu.vector_store %arg4[%c0_11, %c0_12, %c0_13], %25 {strides = array<i32>} : memref<1x32x256xf32, #tpu.memory_space<vmem>>, vector<1x32x256xf32>,
    return
  }
  func.func @transform_0(%arg0: i32) -> (i32, i32, i32) {
    %c0_i32 = arith.constant 0 : i32
    %c0_i32_0 = arith.constant 0 : i32
    %c0_i32_1 = arith.constant 0 : i32
    return %arg0, %c0_i32, %c0_i32_0 : i32, i32, i32
  }
  func.func @transform_1(%arg0: i32) -> (i32, i32) {
    %c0_i32 = arith.constant 0 : i32
    %c0_i32_0 = arith.constant 0 : i32
    %c0_i32_1 = arith.constant 0 : i32
    return %c0_i32, %c0_i32_0 : i32, i32
  }
  func.func @transform_2(%arg0: i32) -> (i32, i32) {
    %c0_i32 = arith.constant 0 : i32
    %c0_i32_0 = arith.constant 0 : i32
    %c0_i32_1 = arith.constant 0 : i32
    return %c0_i32, %c0_i32_0 : i32, i32
  }
  func.func @transform_3(%arg0: i32) -> (i32, i32, i32) {
    %c0_i32 = arith.constant 0 : i32
    %c0_i32_0 = arith.constant 0 : i32
    %c0_i32_1 = arith.constant 0 : i32
    return %arg0, %c0_i32, %c0_i32_0 : i32, i32, i32
  }
}

</mosaic_0001>

<bundles_post_ra>
// kernel: tpu_custom_call.1
= control target key start
LH: loop header
LB: loop body
LE: loop exit
PB: predicated region body
PF: predicated region fallthrough
CT: control target
= control target key end

     0   :  { %8 = vsyncpa [#allocation3], 0  ;;  %s871_s0 = inlined_call_operand.hbm [shape: f32[2,32,256], index: 0, kind: input, shape index: {}]   ;;  %s872_s1 = inlined_call_operand.vmem [shape: f32[32,2], index: 1, kind: input, shape index: {}]   ;;  %s873_s2 = inlined_call_operand.vmem [shape: f32[32,2], index: 2, kind: input, shape index: {}]   ;;  %s874_s3 = inlined_call_operand.hbm [shape: f32[2,32,256], index: 3, kind: output, shape index: {}]  }
   0x1   :  { %10 = vsyncpa [#allocation3 + $0x1], 0 }
   0x2   :  { %11 = vsyncpa [#allocation4], 0 }
   0x3   :  { %13 = vsyncpa [#allocation4 + $0x1], 0  ;;  %s658_s12 = smov 0   ;;  %s660_s13 = smov 0  }
   0x4   :  { %s662_s14 = smov 0   ;;  %s664_s15 = smov 0  }
   0x5 LB: > { %s679_s16 = sadd.s32 4294967295, %s631_s15   ;;  %s446_s17 = sadd.s32 4294967294, %s631_s15   ;;  %s631_s15 = sphi %s664_s15, %s884_s15   ;;  %s627_s14 = sphi %s662_s14, %s883_s14   ;;  %s623_s13 = sphi %s660_s13, %s882_s13   ;;  %s619_s12 = sphi %s658_s12, %s881_s12  }
   0x6   : > { %s683_s18 = sadd.s32 1, %s631_s15   ;;  %s26_s19 = sadd.s32 1, %s627_s14 }
   0x7   : > { %s23_s20 = ssub.s32 %s631_s15, %s683_s18  ;;  %p33_p0 = scmp.ne.s32.totalorder %s627_s14, %s623_s13 }
   0x8   : > { %p24_p1 = scmp.eq.s32.totalorder %s23_s20, 0  ;;  %p34_p2 = scmp.eq.s32.totalorder %s631_s15, 0 }
   0x9   : > { %p39_p3 = scmp.ne.s32.totalorder %s623_s13, %s619_s12  ;;  %p40_p4 = scmp.eq.s32.totalorder %s679_s16, 0 }
   0xa   : > { %s695_s21 = scalar_select %p24_p1, %s627_s14, %s26_s19  }
   0xb   : > { %p697_p5 = por %p34_p2, %p33_p0  ;;  %p701_p6 = por %p40_p4, %p39_p3 }
   0xc   : > { %p105_p7 = scmp.eq.s32.totalorder %s679_s16, 1  ;;  %p111_p8 = scmp.eq.s32.totalorder %s446_s17, 1 }
   0xd   : > { %p478_p10 = scmp.lt.s32.totalorder %s631_s15, 2  ;;  %s137_s26 = sand.u32 1, %s627_s14  }
   0xe   : > { %p708_p11 = por %p105_p7, %p33_p0  ;;  %p712_p12 = por %p111_p8, %p39_p3 }
   0xf   : > { %s464_s27 = sshll.u32 %s631_s15, 6  ;;  %s449_s28 = sshll.u32 %s137_s26, 6 }
  0x10   : > { %s146_s4 = scalar_lea.hbm %s871_s0, %s464_s27  ;;  %s141_s6 = scalar_lea.vmem [#allocation2], %s449_s28 }
  0x11   : > { %s147_s5 = sshll.u32 %s146_s4, 4  ;;  %s149_s7 = sshll.u32 %s141_s6, 4  ;;  %s148_s5 = int_to_ptr.hbm [resolvable:$true] %s147_s5  ;;  %s150_s7 = int_to_ptr.vmem [resolvable:$true] %s149_s7 }
  0x12   : > { %p723_p13 = pnand %p478_p10, %p697_p5  ;;  %p452_p0 = scmp.ge.s32.totalorder %s631_s15, 1 }
  0x13   : > { %p157_p1 = scmp.lt.s32.totalorder %s631_s15, 3  ;;  %s138_s9 = scalar_lea.sflag [#allocation3], %s137_s26 }
  0x14   : > { %s535_s10 = sshra.s32 %s148_s5, 4  ;;  %p539_p3 = pneg %p723_p13  ;;  %s536_s10 = int_to_ptr.hbm [resolvable:$true] %s535_s10 }
  0x15   : > { %s537_s11 = scalar_lea.hbm %s536_s10, 64  ;;  %s542_s20 = scalar_lea.hbm %s871_s0, 128 }
  0x16   : > { %p538_p2 = scmp.ne.s32.totalorder %s536_s10, %s537_s11  ;;  %p543_p5 = scmp.lt.s32.totalorder %s536_s10, %s871_s0 }
  0x17   : > { %p544_p8 = scmp.lt.s32.totalorder %s542_s20, %s537_s11 }
  0x18   : > { %p540_p4 = pnand %p539_p3, %p538_p2 }
  0x19   : > { %p545_p10 = por %p544_p8, %p543_p5 }
  0x1a   : > { %p541_p7 = pneg %p540_p4 }
  0x1c   : > { %p546_p9 = pnand %p545_p10, %p541_p7 }
  0x1e   : > { %549 = shalt.err (!%p546_p9)
}
  0x1f   : > { %s633_s26 = smov 256   ;;  %s634_s28 = smov 16  }
  0x20   : > { %473 = dma.hbm_to_vmem [thread:$0]  (!%p723_p13), %s148_s5, 1024, %s150_s7, %s138_s9, %s633_s26, %s633_s26, %s634_s28  }
  0x21   : > { %p158_p2 = pnand %p452_p0, %p157_p1 }
  0x22   : > { %s744_s29 = sand.u32 (!%p158_p2), 1, %s623_s13  }
  0x23   : > { %161 = sbr.rel (%p158_p2) target bundleno = 358 (0x166), region = 32  ;;  %s453_s30 = sshll.u32 (!%p158_p2), %s744_s29, 6 }
  0x24   : > { %s164_s4 = scalar_lea.sflag (!%p158_p2), [#allocation3], %s744_s29  ;;  %s167_s6 = scalar_lea.vmem (!%p158_p2), [#allocation2], %s453_s30 }
  0x28   : > { %610 = dma.done.wait (%p701_p6), %s164_s4, 1024  }
  0x29   : > { %612 = vsyncadd (%p701_p6), %s164_s4, 4294966272  ;;  %v754_v0 = vld [vmem:[%s167_s6] sm:$0xff]  ;;  %v756_v1 = vld [vmem:[%s167_s6 + $0x8] sm:$0xff]  ;;  %v635_v12 = vmov 256.0   ;;  %vm234_vm1 = vcmask 15360   ;;  %s820_s23 = scalar_lea.vmem [#allocation5], %s453_s30 }
  0x2a   : > { %v758_v2 = vld [vmem:[%s167_s6 + $0x20] sm:$0xff]  ;;  %v207_v3 = vadd.f32 %v756_v1, %v754_v0  ;;  %v762_v4 = vld [vmem:[%s167_s6 + $0x28] sm:$0xff]  ;;  %v766_v6 = vld [vmem:[%s167_s6 + $0x10] sm:$0xff]  ;;  %517 = vrcp.f32 %v635_v12  ;;  %s465_s5 = sshll.u32 %s679_s16, 6  ;;  %s370_s8 = sshll.u32 %s820_s23, 4  ;;  %s371_s8 = int_to_ptr.vmem [resolvable:$true] %s370_s8 }
  0x2b   : > { %v213_v5 = vadd.f32 %v762_v4, %v758_v2  ;;  %v768_v7 = vld [vmem:[%s167_s6 + $0x18] sm:$0xff]  ;;  %v770_v8 = vld [vmem:[%s167_s6 + $0x30] sm:$0xff]  ;;  %v199_v22 = vld [vmem:[%s872_s1] sm:$0xff]  ;;  %s369_s16 = scalar_lea.hbm %s874_s3, %s465_s5  ;;  %s358_s10 = scalar_lea.sflag [#allocation4], %s744_s29 }
  0x2c   : > { %208 = vadd.xlane.f32.xlu0 %v207_v3  ;;  %v772_v9 = vld [vmem:[%s167_s6 + $0x38] sm:$0xff]  ;;  %v210_v10 = vadd.f32 %v768_v7, %v766_v6  ;;  %v201_v24 = vld [vmem:[%s872_s1 + $0x10] sm:$0xff]  ;;  %v200_v25 = vld [vmem:[%s872_s1 + $0x8] sm:$0xff]  ;;  %s372_s9 = sshll.u32 %s369_s16, 4  ;;  %s585_s22 = scalar_lea.hbm %s874_s3, 128  ;;  %s373_s9 = int_to_ptr.hbm [resolvable:$true] %s372_s9 }
  0x2d   : > { %214 = vadd.xlane.f32.xlu1 %v213_v5  ;;  %v216_v11 = vadd.f32 %v772_v9, %v770_v8  ;;  %v202_v29 = vld [vmem:[%s872_s1 + $0x18] sm:$0xff]  ;;  %v205_v49 = vld [vmem:[%s873_s2 + $0x10] sm:$0xff]  ;;  %v203_v50 = vld [vmem:[%s873_s2] sm:$0xff]  ;;  %s579_s11 = sshra.s32 %s373_s9, 4  ;;  %s580_s11 = int_to_ptr.hbm [resolvable:$true] %s579_s11 }
  0x2e   : > { %v206_v48 = vld [vmem:[%s873_s2 + $0x18] sm:$0xff]  ;;  %v204_v58 = vld [vmem:[%s873_s2 + $0x8] sm:$0xff]  ;;  %s581_s17 = scalar_lea.hbm %s580_s11, 64  ;;  %p586_p0 = scmp.lt.s32.totalorder %s580_s11, %s874_s3 }
  0x2f   : > { %p582_p6 = scmp.ne.s32.totalorder %s580_s11, %s581_s17  ;;  %p587_p1 = scmp.lt.s32.totalorder %s585_s22, %s581_s17 }
  0x30   : > { %v518_v13 = vpop.eup %517 }
  0x31   : > { %v220_v14 = vmul.f32 256.0, %v518_v13  ;;  %vm224_vm0 = vweird.f32 %v518_v13  ;;  %p583_p9 = pnand %p582_p6, %p708_p11  ;;  %p588_p3 = por %p587_p1, %p586_p0 }
  0x33   : > { %v221_v15 = vsub.f32 1.0, %v220_v14  ;;  %p584_p13 = pneg %p583_p9 }
  0x34   : > { %211 = vadd.xlane.f32.xlu0 %v210_v10 }
  0x35   : > { %217 = vadd.xlane.f32.xlu1 %v216_v11  ;;  %v222_v16 = vmul.f32 %v518_v13, %v221_v15  ;;  %p589_p4 = pnand %p588_p3, %p584_p13 }
  0x37   : > { %v223_v17 = vadd.f32 %v518_v13, %v222_v16 }
  0x39   : > { %v225_v20 = vsel %vm224_vm0, %v518_v13, %v223_v17 }
  0x9f   : > { %v209_v18 = vpop.xlane.xlu0 %208 }
  0xa0   : > { %v215_v19 = vpop.xlane.xlu1 %214  ;;  %v226_v21 = vmul.f32 %v225_v20, %v209_v18 }
  0xa1   : > { %v228_v23 = vmul.f32 %v225_v20, %v215_v19 }
  0xa2   : > { %v230_v27 = vmul.f32 %v226_v21, %v199_v22 }
  0xa3   : > { %v232_v32 = vmul.f32 %v228_v23, %v201_v24 }
  0xa4   : > { %v235_v35 = vsel %vm234_vm1, %v230_v27, 0.0 }
  0xa5   : > { %v238_v38 = vsel %vm234_vm1, %v232_v32, 0.0 }
  0xa7   : > { %v212_v26 = vpop.xlane.xlu0 %211 }
  0xa8   : > { %v227_v28 = vmul.f32 %v225_v20, %v212_v26  ;;  %v218_v30 = vpop.xlane.xlu1 %217 }
  0xa9   : > { %v229_v31 = vmul.f32 %v225_v20, %v218_v30 }
  0xaa   : > { %v231_v33 = vmul.f32 %v227_v28, %v200_v25 }
  0xab   : > { %v233_v34 = vmul.f32 %v229_v31, %v202_v29 }
  0xac   : > { %v236_v36 = vsel %vm234_vm1, %v231_v33, 0.0 }
  0xad   : > { %v237_v37 = vadd.f32 %v236_v36, %v235_v35  ;;  %v240_v39 = vsel %vm234_vm1, %v233_v34, 0.0 }
  0xaf   : > { %v239_v40 = vadd.f32 %v238_v38, %v237_v37 }
  0xb1   : > { %v241_v41 = vadd.f32 %v240_v39, %v239_v40 }
  0xb3   : > { %v242_v42 = vrot.slane %v241_v41, 4 }
  0xb5   : > { %v243_v43 = vadd.f32 %v242_v42, %v241_v41 }
  0xb7   : > { %v244_v44 = vrot.slane %v243_v43, 2 }
  0xb9   : > { %v245_v45 = vadd.f32 %v244_v44, %v243_v43 }
  0xbb   : > { %v246_v46 = vrot.slane %v245_v45, 1 }
  0xbd   : > { %v247_v47 = vadd.f32 %v246_v46, %v245_v45 }
  0xbf   : > { %v248_v51 = vmax.f32 %v247_v47, 0.0 }
  0xc1   : > { %v252_v52 = vmul.f32 %v248_v51, %v206_v48  ;;  %v251_v53 = vmul.f32 %v248_v51, %v205_v49  ;;  %v249_v54 = vmul.f32 %v248_v51, %v203_v50  ;;  %v250_v59 = vmul.f32 %v248_v51, %v204_v58 }
  0xc3   : > { %v262_v55 = vsel %vm234_vm1, %v252_v52, 0.0  ;;  %v259_v56 = vsel %vm234_vm1, %v251_v53, 0.0  ;;  %v253_v57 = vsel %vm234_vm1, %v249_v54, 0.0  ;;  %v256_v60 = vsel %vm234_vm1, %v250_v59, 0.0 }
  0xc4   : > { %263 = vadd.xlane.f32.xlu1 %v262_v55  ;;  %260 = vadd.xlane.f32.xlu0 %v259_v56 }
  0xc5   : > { %254 = vadd.xlane.f32.xlu2 %v253_v57 }
  0xcd   : > { %257 = vadd.xlane.f32.xlu2 %v256_v60 }
 0x137   : > { %v264_v61 = vpop.xlane.xlu1 %263  ;;  %v261_v62 = vpop.xlane.xlu0 %260 }
 0x138   : > { %v458_v63 = vmul.f32 -1.442695, %v264_v61  ;;  %v457_v3 = vmul.f32 -1.442695, %v261_v62  ;;  %v255_v5 = vpop.xlane.xlu2 %254 }
 0x139   : > { %v455_v10 = vmul.f32 -1.442695, %v255_v5 }
 0x13a   : > { %519 = vpow2.f32 %v458_v63 }
 0x13b   : > { %521 = vpow2.f32 %v457_v3 }
 0x13c   : > { %523 = vpow2.f32 %v455_v10 }
 0x140   : > { %v520_v11 = vpop.eup %519  ;;  %v258_v12 = vpop.xlane.xlu2 %257 }
 0x141   : > { %v522_v13 = vpop.eup %521  ;;  %v280_v14 = vadd.f32 1.0, %v520_v11  ;;  %v456_v15 = vmul.f32 -1.442695, %v258_v12 }
 0x142   : > { %v524_v16 = vpop.eup %523  ;;  %v279_v17 = vadd.f32 1.0, %v522_v13 }
 0x143   : > { %525 = vrcp.f32 %v280_v14  ;;  %v277_v18 = vadd.f32 1.0, %v524_v16  ;;  %v335_v25 = vand.u32 2147483647, %v280_v14  ;;  %v337_v28 = vand.u32 2147483648, %v280_v14 }
 0x144   : > { %527 = vrcp.f32 %v279_v17  ;;  %v322_v30 = vand.u32 2147483648, %v279_v17  ;;  %vm331_vm3 = vweird.f32 %v280_v14  ;;  %v320_v34 = vand.u32 2147483647, %v279_v17 }
 0x145   : > { %529 = vpow2.f32 %v456_v15  ;;  %vm336_vm5 = vcmp.eq.f32.partialorder %v335_v25, 8.507059e+37  ;;  %vm316_vm6 = vweird.f32 %v279_v17  ;;  %v338_v37 = vor.u32 1.1754944e-38, %v337_v28 }
 0x146   : > { %531 = vrcp.f32 %v277_v18  ;;  %v323_v39 = vor.u32 1.1754944e-38, %v322_v30  ;;  %v292_v40 = vand.u32 2147483648, %v277_v18  ;;  %v290_v43 = vand.u32 2147483647, %v277_v18 }
 0x147   : > { %vm321_vm10 = vcmp.eq.f32.partialorder %v320_v34, 8.507059e+37  ;;  %vm286_vm11 = vweird.f32 %v277_v18 }
 0x148   : > { %v293_v53 = vor.u32 1.1754944e-38, %v292_v40  ;;  %vm291_vm13 = vcmp.eq.f32.partialorder %v290_v43, 8.507059e+37 }
 0x149   : > { %v526_v19 = vpop.eup %525 }
 0x14a   : > { %v528_v20 = vpop.eup %527  ;;  %v327_v21 = vmul.f32 %v526_v19, %v280_v14  ;;  %vm332_vm2 = vweird.f32 %v526_v19 }
 0x14b   : > { %v530_v22 = vpop.eup %529  ;;  %v312_v23 = vmul.f32 %v528_v20, %v279_v17  ;;  %vm317_vm4 = vweird.f32 %v528_v20  ;;  %vm333_vm7 = vmor %vm331_vm3, %vm332_vm2 }
 0x14c   : > { %v328_v24 = vsub.f32 1.0, %v327_v21  ;;  %v810_v26 = vadd.f32 1.0, %v530_v22  ;;  %v532_v27 = vpop.eup %531  ;;  %vm318_vm8 = vmor %vm316_vm6, %vm317_vm4 }
 0x14d   : > { %v313_v29 = vsub.f32 1.0, %v312_v23  ;;  %v282_v32 = vmul.f32 %v532_v27, %v277_v18  ;;  %vm287_vm9 = vweird.f32 %v532_v27 }
 0x14e   : > { %v329_v31 = vmul.f32 %v526_v19, %v328_v24  ;;  %533 = vrcp.f32 %v810_v26  ;;  %vm288_vm12 = vmor %vm286_vm11, %vm287_vm9  ;;  %v307_v56 = vand.u32 2147483648, %v810_v26  ;;  %v305_v58 = vand.u32 2147483647, %v810_v26 }
 0x14f   : > { %v314_v33 = vmul.f32 %v528_v20, %v313_v29  ;;  %v283_v36 = vsub.f32 1.0, %v282_v32  ;;  %vm301_vm15 = vweird.f32 %v810_v26 }
 0x150   : > { %v330_v35 = vadd.f32 %v526_v19, %v329_v31  ;;  %vm306_vm1 = vcmp.eq.f32.partialorder %v305_v58, 8.507059e+37 }
 0x151   : > { %v315_v38 = vadd.f32 %v528_v20, %v314_v33  ;;  %v284_v42 = vmul.f32 %v532_v27, %v283_v36 }
 0x152   : > { %v334_v41 = vsel %vm333_vm7, %v526_v19, %v330_v35 }
 0x153   : > { %v339_v44 = vsel %vm336_vm5, %v338_v37, %v334_v41  ;;  %v319_v45 = vsel %vm318_vm8, %v528_v20, %v315_v38  ;;  %v285_v50 = vadd.f32 %v532_v27, %v284_v42 }
 0x154   : > { %v534_v46 = vpop.eup %533  ;;  %v347_v47 = vmul.f32 %v339_v44, %v770_v8  ;;  %v348_v48 = vmul.f32 %v339_v44, %v772_v9  ;;  %v324_v49 = vsel %vm321_vm10, %v323_v39, %v319_v45 }
 0x155   : > { %v345_v51 = vmul.f32 %v324_v49, %v758_v2  ;;  %v346_v52 = vmul.f32 %v324_v49, %v762_v4  ;;  %v297_v54 = vmul.f32 %v534_v46, %v810_v26  ;;  %v289_v8 = vsel %vm288_vm12, %v532_v27, %v285_v50 }
 0x156   : > { %355 = vst [vmem:[%s820_s23 + $0x30] sm:$0xff] %v347_v47  ;;  %v294_v2 = vsel %vm291_vm13, %v293_v53, %v289_v8  ;;  %vm302_vm14 = vweird.f32 %v534_v46 }
 0x157   : > { %356 = vst [vmem:[%s820_s23 + $0x38] sm:$0xff] %v348_v48  ;;  %v298_v4 = vsub.f32 1.0, %v297_v54  ;;  %v341_v9 = vmul.f32 %v294_v2, %v754_v0  ;;  %v342_v55 = vmul.f32 %v294_v2, %v756_v1  ;;  %vm303_vm0 = vmor %vm301_vm15, %vm302_vm14  ;;  %v308_v0 = vor.u32 1.1754944e-38, %v307_v56 }
 0x158   : > { %353 = vst [vmem:[%s820_s23 + $0x20] sm:$0xff] %v345_v51 }
 0x159   : > { %354 = vst [vmem:[%s820_s23 + $0x28] sm:$0xff] %v346_v52  ;;  %v299_v57 = vmul.f32 %v534_v46, %v298_v4 }
 0x15a   : > { %349 = vst [vmem:[%s820_s23] sm:$0xff] %v341_v9 }
 0x15b   : > { %350 = vst [vmem:[%s820_s23 + $0x8] sm:$0xff] %v342_v55  ;;  %v300_v59 = vadd.f32 %v534_v46, %v299_v57 }
 0x15d   : > { %v304_v1 = vsel %vm303_vm0, %v534_v46, %v300_v59 }
 0x15e   : > { %v309_v60 = vsel %vm306_vm1, %v308_v0, %v304_v1 }
 0x15f   : > { %v343_v61 = vmul.f32 %v309_v60, %v766_v6  ;;  %v344_v62 = vmul.f32 %v309_v60, %v768_v7 }
 0x161   : > { %351 = vst [vmem:[%s820_s23 + $0x10] sm:$0xff] %v343_v61 }
 0x162   : > { %352 = vst [vmem:[%s820_s23 + $0x18] sm:$0xff] %v344_v62 }
 0x163   : > { %592 = shalt.err (!%p589_p4)
}
 0x164   : > { %s636_s29 = smov 256   ;;  %s637_s28 = smov 16  }
 0x165   : > { %468 = dma.vmem_to_hbm [thread:$0]  (%p708_p11), %s371_s8, 1024, %s373_s9, %s358_s10, %s636_s29, %s636_s29, %s637_s28  }
 0x166 PF: > { %s387_s4 = sand.u32 1, %s619_s12   ;;  %p880_p7 = scmp.ge.s32.totalorder %s631_s15, 2 }
 0x167   : > { %s388_s6 = scalar_lea.sflag [#allocation4], %s387_s4 }
 0x168   : > { %p475_p5 = pnand %p880_p7, %p712_p12 }
 0x16a   : > { %p476_p8 = pneg %p475_p5 }
 0x16c   : > { %614 = dma.done.wait (%p476_p8), %s388_s6, 1024  }
 0x16d   : > { %616 = vsyncadd (%p476_p8), %s388_s6, 4294966272  ;;  %p16_p10 = scmp.ge.s32.totalorder %s683_s18, 4   ;;  %s881_s12 = smov %s623_s13 }
 0x16e   : > { %s882_s13 = smov %s627_s14  ;;  %s883_s14 = smov %s695_s21 }
 0x16f   : > { %s884_s15 = smov %s683_s18  ;;  %18 = sbr.rel (!%p16_p10) target bundleno = 5 (0x5), region = 77 }
 0x174   :  { %394 = vsyncpa [#allocation3], 1 }
 0x175   :  { %396 = vsyncpa [#allocation3 + $0x1], 1 }
 0x176   :  { %397 = vsyncpa [#allocation4], 1 }
 0x177   :  { %399 = vsyncpa [#allocation4 + $0x1], 1 }

</bundles_post_ra>
